<compile_context>
chip_gen: v6e
topology: v6e:2x2x1
jax: 0.10.0
libtpu: 0.0.40
codegen_flags: <defaults>
</compile_context>

<pallas_src>
import jax
import jax.numpy as jnp
from jax.experimental import pallas as pl
from jax.experimental.pallas import tpu as pltpu

# ---- Model hyperparameters (small, deterministic, consistent with the module) ----
K = 4          # number of weight rows produced by the actor
SE = 16        # service embedding dim
UE = 32        # user embedding dim
FE = 8         # filters embedding dim
SPE = 8        # search phrase embedding dim
N = 6          # history length
XO = UE + FE + SPE        # 48 : packed non-history activation width
D = XO + SE               # 64 : output_layer input dim (reordered: [user|filters|sp|hist])
KSE = K * SE              # 64
OUT_LANES = 128           # lane-dense kernel output width (multiple of 128)


def actor_kernel(xo_ref, xh_ref, whe_ref, bias_ref, wout_ref, out_ref, x_scr):
    """Fused ActorModel forward over one batch tile.

    xo_ref   : (TB, XO)       packed [user | filters | search_phrase]
    xh_ref   : (TB, N*SE)     flattened services history
    whe_ref  : (N*SE, SE)     history-embedder weight with mean-pool folded (tiled w_he/N)
    bias_ref : (2, 128)       row 0 = b_he (zero-padded), row 1 = b_out (zero-padded)
    wout_ref : (D, 128)       output_layer weight, rows reordered to [user|filters|sp|hist],
                              columns zero-padded 64 -> 128 for lane-dense stores
    out_ref  : (TB, 128)
    x_scr    : (TB, D)        VMEM scratch holding concat([xo, hist_emb])
    """
    bias = bias_ref[...]
    b_he = bias[0:1, :SE]          # (1, SE)
    b_out = bias[1:2, :]           # (1, 128)

    # history embedder: mean-pool folded into whe -> single MXU pass, then bias + ReLU
    h = jnp.maximum(
        jnp.dot(xh_ref[...], whe_ref[...], preferred_element_type=jnp.float32) + b_he,
        0.0)                        # (TB, SE)

    # Build concat([user|filters|sp, hist_emb]) in VMEM scratch, then ONE output matmul.
    x_scr[:, :XO] = xo_ref[...]
    x_scr[:, XO:] = h
    out_ref[...] = (
        jnp.dot(x_scr[...], wout_ref[...], preferred_element_type=jnp.float32) + b_out)


def init_params(key):
    """Deterministic parameter initialization (synthetic, no checkpoint)."""
    k1, k2, k3, k4 = jax.random.split(key, 4)
    w_he = jax.random.normal(k1, (SE, SE), jnp.float32) * 0.1
    b_he = jax.random.normal(k2, (SE,), jnp.float32) * 0.01
    w_out = jax.random.normal(k3, (UE + SE + FE + SPE, KSE), jnp.float32) * 0.1
    b_out = jax.random.normal(k4, (KSE,), jnp.float32) * 0.01
    return (w_he, b_he, w_out, b_out)


def pack_params(params):
    """One-time parameter packing (do NOT redo per request).

    - folds mean-pool into the history-embedder weight (tile(w_he / N, (N, 1))),
    - reorders output_layer rows to the packed activation layout [user|filters|sp|hist],
    - zero-pads the output dim 64 -> 128 so the kernel store is lane-dense,
    - packs both biases into a single (2, 128) operand.
    """
    w_he, b_he, w_out, b_out = params
    w_he_m = jnp.tile(w_he / N, (N, 1))                          # (N*SE, SE)
    w_u = w_out[:UE]
    w_h = w_out[UE:UE + SE]
    w_f = w_out[UE + SE:UE + SE + FE]
    w_s = w_out[UE + SE + FE:]
    w_out_r = jnp.concatenate([w_u, w_f, w_s, w_h], axis=0)      # (D, K*SE)
    w_out_p = jnp.pad(w_out_r, ((0, 0), (0, OUT_LANES - KSE)))   # (D, 128)
    bias = jnp.stack([jnp.pad(b_he, (0, OUT_LANES - SE)),
                      jnp.pad(b_out, (0, OUT_LANES - KSE))])     # (2, 128)
    return (w_he_m, bias, w_out_p)


def actor_model_forward_batched(user, services_history, filters, search_phrase, packed):
    """Batched ActorModel forward: (B, ...) inputs -> (B, K, SE)."""
    w_he_m, bias, w_out_p = packed
    B = user.shape[0]

    # Activation packing (cheap wrapper-side glue; cuts per-call DMA count).
    xo = jnp.concatenate([user, filters, search_phrase], axis=1)   # (B, XO)
    xh = services_history.reshape(B, N * SE)                       # (B, N*SE)

    tb = B if B <= 128 else 128
    assert B % tb == 0, "batch must be a multiple of the 128-row tile (pad the batch)"
    grid = (B // tb,)

    out = pl.pallas_call(
        actor_kernel,
        out_shape=jax.ShapeDtypeStruct((B, OUT_LANES), jnp.float32),
        grid_spec=pltpu.PrefetchScalarGridSpec(
            num_scalar_prefetch=0,
            grid=grid,
            in_specs=[
                pl.BlockSpec((tb, XO), lambda i: (i, 0)),           # batch-tiled activations
                pl.BlockSpec((tb, N * SE), lambda i: (i, 0)),
                pl.BlockSpec((N * SE, SE), lambda i: (0, 0)),       # grid-invariant weights
                pl.BlockSpec((2, OUT_LANES), lambda i: (0, 0)),
                pl.BlockSpec((D, OUT_LANES), lambda i: (0, 0)),
            ],
            out_specs=pl.BlockSpec((tb, OUT_LANES), lambda i: (i, 0)),
            scratch_shapes=[pltpu.VMEM((tb, D), jnp.float32)],
        ),
        # batch axis is data-parallel -> sharded across both TensorCores on v7x
        compiler_params=pltpu.CompilerParams(dimension_semantics=("parallel",)),
    )(xo, xh, w_he_m, bias, w_out_p)

    return out[:, :KSE].reshape(B, K, SE)


def actor_model_forward(user, services_history, filters, search_phrase, packed):
    """Single-example forward with the module's signature: returns (K, SE)."""
    out = actor_model_forward_batched(
        user[None], services_history[None], filters[None], search_phrase[None], packed)
    return out[0]


def reference_forward(user, services_history, filters, search_phrase, params):
    """Plain-JAX single-example reference for correctness checking."""
    w_he, b_he, w_out, b_out = params
    h = jnp.maximum(jnp.mean(services_history, axis=0) @ w_he + b_he, 0.0)
    x = jnp.concatenate([user, h, filters, search_phrase], axis=0)
    return (x @ w_out + b_out).reshape(K, SE)


if __name__ == "__main__":
    key = jax.random.PRNGKey(0)
    k_in, k_par = jax.random.split(key)
    ku, kh, kf, ks = jax.random.split(k_in, 4)

    B = 8
    user_b = jax.random.normal(ku, (B, UE), jnp.float32)
    hist_b = jax.random.normal(kh, (B, N, SE), jnp.float32)
    filt_b = jax.random.normal(kf, (B, FE), jnp.float32)
    sp_b = jax.random.normal(ks, (B, SPE), jnp.float32)

    params = init_params(k_par)
    packed = pack_params(params)   # one-time packing; reuse across calls

    # Batched path (amortizes DMA / launch overhead over B requests).
    out_b = jax.block_until_ready(
        actor_model_forward_batched(user_b, hist_b, filt_b, sp_b, packed))
    ref_b = jax.vmap(
        lambda u, h, f, s: reference_forward(u, h, f, s, params))(user_b, hist_b, filt_b, sp_b)
    assert out_b.shape == (B, K, SE), f"bad batched output shape {out_b.shape}"
    assert jnp.allclose(out_b, ref_b, atol=1e-4, rtol=1e-4), "batched mismatch vs reference"

    # Single-example path (exact module signature / semantics).
    out_1 = jax.block_until_ready(
        actor_model_forward(user_b[0], hist_b[0], filt_b[0], sp_b[0], packed))
    ref_1 = reference_forward(user_b[0], hist_b[0], filt_b[0], sp_b[0], params)
    assert out_1.shape == (K, SE), f"bad output shape {out_1.shape}"
    assert jnp.allclose(out_1, ref_1, atol=1e-4, rtol=1e-4), "single-example mismatch vs reference"

    print("KERNEL_OK")
</pallas_src>

<mosaic_0001>
module attributes {stable_mosaic.version = 11 : i64} {
  func.func @actor_kernel(%arg0: i32, %arg1: memref<8x48xf32, #tpu.memory_space<vmem>>, %arg2: memref<8x96xf32, #tpu.memory_space<vmem>>, %arg3: memref<96x16xf32, #tpu.memory_space<vmem>>, %arg4: memref<2x128xf32, #tpu.memory_space<vmem>>, %arg5: memref<64x128xf32, #tpu.memory_space<vmem>>, %arg6: memref<8x128xf32, #tpu.memory_space<vmem>>, %arg7: memref<8x64xf32, #tpu.memory_space<vmem>>) attributes {dimension_semantics = [#tpu.dimension_semantics<parallel>], iteration_bounds = array<i64: 1>, scalar_prefetch = 0 : i64, scratch_operands = 1 : i64, tpu.core_type = #tpu.core_type<tc>, window_params = [{transform_indices = @transform_0, window_bounds = array<i64: 8, 48>}, {transform_indices = @transform_1, window_bounds = array<i64: 8, 96>}, {pipeline_mode = #tpu.pipeline_mode<synchronous>, transform_indices = @transform_2, window_bounds = array<i64: 96, 16>}, {pipeline_mode = #tpu.pipeline_mode<synchronous>, transform_indices = @transform_3, window_bounds = array<i64: 2, 128>}, {pipeline_mode = #tpu.pipeline_mode<synchronous>, transform_indices = @transform_4, window_bounds = array<i64: 64, 128>}, {transform_indices = @transform_5, window_bounds = array<i64: 8, 128>}]} {
    %c0 = arith.constant 0 : index
    %c0_0 = arith.constant 0 : index
    %0 = vector.load %arg4[%c0, %c0_0] : memref<2x128xf32, #tpu.memory_space<vmem>>, vector<2x128xf32>
    %1 = vector.extract_strided_slice %0 {offsets = [0, 0], sizes = [1, 16], strides = [1, 1]} : vector<2x128xf32> to vector<1x16xf32>
    %2 = vector.extract_strided_slice %0 {offsets = [1, 0], sizes = [1, 128], strides = [1, 1]} : vector<2x128xf32> to vector<1x128xf32>
    %c0_1 = arith.constant 0 : index
    %c0_2 = arith.constant 0 : index
    %3 = vector.load %arg2[%c0_1, %c0_2] : memref<8x96xf32, #tpu.memory_space<vmem>>, vector<8x96xf32>
    %c0_3 = arith.constant 0 : index
    %c0_4 = arith.constant 0 : index
    %4 = vector.load %arg3[%c0_3, %c0_4] : memref<96x16xf32, #tpu.memory_space<vmem>>, vector<96x16xf32>
    %cst = arith.constant dense<0.000000e+00> : vector<8x16xf32>
    %5 = tpu.matmul %3, %4, %cst {dimension_numbers = #tpu.dot_dimension_numbers<[1], [0], [0], [1], [0, 0, 1, 1], [], []>} : vector<8x96xf32>, vector<96x16xf32>, vector<8x16xf32> -> vector<8x16xf32>
    %6 = vector.broadcast %1 : vector<1x16xf32> to vector<8x16xf32>
    %7 = arith.addf %5, %6 : vector<8x16xf32>
    %cst_5 = arith.constant 0.000000e+00 : f32
    %8 = vector.broadcast %cst_5 : f32 to vector<8x16xf32>
    %9 = arith.maximumf %7, %8 : vector<8x16xf32>
    %c0_6 = arith.constant 0 : index
    %c0_7 = arith.constant 0 : index
    %10 = vector.load %arg1[%c0_6, %c0_7] : memref<8x48xf32, #tpu.memory_space<vmem>>, vector<8x48xf32>
    %c0_8 = arith.constant 0 : index
    %c0_9 = arith.constant 0 : index
    %11 = vector.load %arg7[%c0_8, %c0_9] : memref<8x64xf32, #tpu.memory_space<vmem>>, vector<8x48xf32>
    tpu.vector_store %arg7[%c0_8, %c0_9], %10 {strides = array<i32>} : memref<8x64xf32, #tpu.memory_space<vmem>>, vector<8x48xf32>,
    %c0_10 = arith.constant 0 : index
    %c48 = arith.constant 48 : index
    %12 = vector.load %arg7[%c0_10, %c48] : memref<8x64xf32, #tpu.memory_space<vmem>>, vector<8x16xf32>
    tpu.vector_store %arg7[%c0_10, %c48], %9 {strides = array<i32>} : memref<8x64xf32, #tpu.memory_space<vmem>>, vector<8x16xf32>,
    %c0_11 = arith.constant 0 : index
    %c0_12 = arith.constant 0 : index
    %13 = vector.load %arg7[%c0_11, %c0_12] : memref<8x64xf32, #tpu.memory_space<vmem>>, vector<8x64xf32>
    %c0_13 = arith.constant 0 : index
    %c0_14 = arith.constant 0 : index
    %14 = vector.load %arg5[%c0_13, %c0_14] : memref<64x128xf32, #tpu.memory_space<vmem>>, vector<64x128xf32>
    %cst_15 = arith.constant dense<0.000000e+00> : vector<8x128xf32>
    %15 = tpu.matmul %13, %14, %cst_15 {dimension_numbers = #tpu.dot_dimension_numbers<[1], [0], [0], [1], [0, 0, 1, 1], [], []>} : vector<8x64xf32>, vector<64x128xf32>, vector<8x128xf32> -> vector<8x128xf32>
    %16 = vector.broadcast %2 : vector<1x128xf32> to vector<8x128xf32>
    %17 = arith.addf %15, %16 : vector<8x128xf32>
    %c0_16 = arith.constant 0 : index
    %c0_17 = arith.constant 0 : index
    %18 = vector.load %arg6[%c0_16, %c0_17] : memref<8x128xf32, #tpu.memory_space<vmem>>, vector<8x128xf32>
    tpu.vector_store %arg6[%c0_16, %c0_17], %17 {strides = array<i32>} : memref<8x128xf32, #tpu.memory_space<vmem>>, vector<8x128xf32>,
    return
  }
  func.func @transform_0(%arg0: i32) -> (i32, i32) {
    %c0_i32 = arith.constant 0 : i32
    %c0_i32_0 = arith.constant 0 : i32
    return %arg0, %c0_i32 : i32, i32
  }
  func.func @transform_1(%arg0: i32) -> (i32, i32) {
    %c0_i32 = arith.constant 0 : i32
    %c0_i32_0 = arith.constant 0 : i32
    return %arg0, %c0_i32 : i32, i32
  }
  func.func @transform_2(%arg0: i32) -> (i32, i32) {
    %c0_i32 = arith.constant 0 : i32
    %c0_i32_0 = arith.constant 0 : i32
    %c0_i32_1 = arith.constant 0 : i32
    return %c0_i32, %c0_i32_0 : i32, i32
  }
  func.func @transform_3(%arg0: i32) -> (i32, i32) {
    %c0_i32 = arith.constant 0 : i32
    %c0_i32_0 = arith.constant 0 : i32
    %c0_i32_1 = arith.constant 0 : i32
    return %c0_i32, %c0_i32_0 : i32, i32
  }
  func.func @transform_4(%arg0: i32) -> (i32, i32) {
    %c0_i32 = arith.constant 0 : i32
    %c0_i32_0 = arith.constant 0 : i32
    %c0_i32_1 = arith.constant 0 : i32
    return %c0_i32, %c0_i32_0 : i32, i32
  }
  func.func @transform_5(%arg0: i32) -> (i32, i32) {
    %c0_i32 = arith.constant 0 : i32
    %c0_i32_0 = arith.constant 0 : i32
    return %arg0, %c0_i32 : i32, i32
  }
}

</mosaic_0001>

<bundles_post_ra>
// kernel: tpu_custom_call.1
= control target key start
LH: loop header
LB: loop body
LE: loop exit
PB: predicated region body
PF: predicated region fallthrough
CT: control target
= control target key end

     0   :  { %v321_v1 = vmov 0.0   ;;  %vm322_vm0 = vmmov 0   ;;  %s449_s0 = inlined_call_operand.vmem [shape: f32[8,48], index: 0, kind: input, shape index: {}]   ;;  %s450_s1 = inlined_call_operand.vmem [shape: f32[8,96], index: 1, kind: input, shape index: {}]   ;;  %s451_s2 = inlined_call_operand.vmem [shape: f32[96,16], index: 2, kind: input, shape index: {}]   ;;  %s452_s3 = inlined_call_operand.vmem [shape: f32[2,128], index: 3, kind: input, shape index: {}]   ;;  %s453_s4 = inlined_call_operand.vmem [shape: f32[64,128], index: 4, kind: input, shape index: {}]   ;;  %s454_s5 = inlined_call_operand.hbm [shape: f32[8,128], index: 5, kind: output, shape index: {}]  }
   0x1   :  { %v34_v0 = vld [vmem:[%s451_s2 + $0x58] sm:$0xff]  ;;  %249 = vmatprep.subr.mxu0 %v321_v1  ;;  %v33_v2 = vld [vmem:[%s451_s2 + $0x50] sm:$0xff]  ;;  %273 = vmatprep.mubr.msk.f32.mxu0 %vm322_vm0, %v321_v1  ;;  %v32_v3 = vld [vmem:[%s451_s2 + $0x48] sm:$0xff] }
   0x2   :  { %250 = vmatpush3.msra.mxu0 %v34_v0  ;;  %276 = vmatprep.subr.mxu1 %v321_v1 }
   0x3   :  { %251 = vmatprep.subr.mxu0 %v321_v1  ;;  %292 = vmatprep.mubr.msk.f32.mxu1 %vm322_vm0, %v321_v1 }
   0x4   :  { %252 = vmatpush3.msra.mxu0 %v33_v2 }
   0x5   :  { %10 = vsyncpa [#allocation4], 0  ;;  %253 = vmatprep.subr.mxu0 %v321_v1  ;;  %v31_v4 = vld [vmem:[%s451_s2 + $0x40] sm:$0xff]  ;;  %v30_v5 = vld [vmem:[%s451_s2 + $0x38] sm:$0xff]  ;;  %vm39_vm1 = vcmask 785408   ;;  %vm115_vm2 = vcmask 392192   ;;  %v35_v18 = vlaneseq }
   0x6   :  { %254 = vmatpush3.msra.mxu0 %v32_v3  ;;  %v29_v6 = vld [vmem:[%s451_s2 + $0x30] sm:$0xff]  ;;  %v28_v7 = vld [vmem:[%s451_s2 + $0x28] sm:$0xff]  ;;  %v27_v8 = vld [vmem:[%s451_s2 + $0x20] sm:$0xff]  ;;  %vm121_vm3 = vcmask 523648   ;;  %vm136_vm4 = vcmask 523264  }
   0x7   :  { %255 = vmatprep.subr.mxu0 %v321_v1  ;;  %v26_v9 = vld [vmem:[%s451_s2 + $0x18] sm:$0xff]  ;;  %v25_v10 = vld [vmem:[%s451_s2 + $0x10] sm:$0xff]  ;;  %v24_v11 = vld [vmem:[%s451_s2 + $0x8] sm:$0xff]  ;;  %v36_v19 = vshrl.u32 %v35_v18, 7 }
   0x8   :  { %256 = vmatpush3.msra.mxu0 %v31_v4  ;;  %v23_v12 = vld [vmem:[%s451_s2] sm:$0xff]  ;;  %v131_v14 = vld [vmem:[%s453_s4 + $0x38] sm:$0xff]  ;;  %v130_v15 = vld [vmem:[%s453_s4 + $0x30] sm:$0xff] }
   0x9   :  { %257 = vmatprep.subr.mxu0 %v321_v1  ;;  %v22_v13 = vld [vmem:[%s450_s1] sm:$0xff]  ;;  %277 = vmatpush3.msra.mxu1 %v131_v14  ;;  %v129_v17 = vld [vmem:[%s453_s4 + $0x28] sm:$0xff]  ;;  %v127_v21 = vld [vmem:[%s453_s4 + $0x18] sm:$0xff]  ;;  %v37_v23 = vsub.s32 0, %v36_v19  ;;  %v134_v34 = vsub.s32 1, %v36_v19 }
   0xa   :  { %258 = vmatpush3.msra.mxu0 %v30_v5  ;;  %v114_v16 = vld [vmem:[%s449_s0] sm:$0xff]  ;;  %278 = vmatprep.subr.mxu1 %v321_v1  ;;  %v126_v22 = vld [vmem:[%s453_s4 + $0x10] sm:$0xff]  ;;  %v125_v25 = vld [vmem:[%s453_s4 + $0x8] sm:$0xff] }
   0xb   :  { %259 = vmatprep.subr.mxu0 %v321_v1  ;;  %116 = vst.msk [vmem:[#allocation2] sm:$0xff] %vm115_vm2, %v114_v16  ;;  %279 = vmatpush3.msra.mxu1 %v130_v15  ;;  %v128_v20 = vld [vmem:[%s453_s4 + $0x20] sm:$0xff] }
   0xc   :  { %260 = vmatpush3.msra.mxu0 %v29_v6  ;;  %280 = vmatprep.subr.mxu1 %v321_v1  ;;  %v21_v24 = vld [vmem:[%s452_s3] sm:$0x3]  ;;  %s323_s3 = smov 48  }
   0xd   :  { %261 = vmatprep.subr.mxu0 %v321_v1  ;;  %281 = vmatpush3.msra.mxu1 %v129_v17  ;;  %v124_v26 = vld [vmem:[%s453_s4] sm:$0xff]  ;;  %v38_v27 = vrot.slane %v21_v24, %v37_v23  ;;  %v135_v35 = vrot.slane %v21_v24, %v134_v34  ;;  %s324_s4 = smov [#allocation3]  }
   0xe   :  { %262 = vmatpush3.msra.mxu0 %v28_v7  ;;  %282 = vmatprep.subr.mxu1 %v321_v1  ;;  %s217_s11 = sshll.u32 %s324_s4, 4  ;;  %s218_s11 = int_to_ptr.vmem [resolvable:$true] %s217_s11 }
   0xf   :  { %263 = vmatprep.subr.mxu0 %v321_v1  ;;  %283 = vmatpush3.msra.mxu1 %v128_v20  ;;  %s299_s12 = scalar_lea.vmem %s218_s11, 128  ;;  %p304_p1 = scmp.lt.s32.totalorder %s218_s11, %s218_s11 }
  0x10   :  { %264 = vmatpush3.msra.mxu0 %v27_v8  ;;  %284 = vmatprep.subr.mxu1 %v321_v1  ;;  %p300_p0 = scmp.ne.s32.totalorder %s218_s11, %s299_s12  ;;  %p305_p2 = scmp.lt.s32.totalorder %s299_s12, %s299_s12 }
  0x11   :  { %265 = vmatprep.subr.mxu0 %v321_v1  ;;  %285 = vmatpush3.msra.mxu1 %v127_v21 }
  0x12   :  { %266 = vmatpush3.msra.mxu0 %v26_v9  ;;  %286 = vmatprep.subr.mxu1 %v321_v1  ;;  %p306_p3 = por %p305_p2, %p304_p1 }
  0x13   :  { %267 = vmatprep.subr.mxu0 %v321_v1  ;;  %287 = vmatpush3.msra.mxu1 %v126_v22 }
  0x14   :  { %268 = vmatpush3.msra.mxu0 %v25_v10  ;;  %288 = vmatprep.subr.mxu1 %v321_v1  ;;  %p307_p4 = pnand %p306_p3, %p300_p0 }
  0x15   :  { %269 = vmatprep.subr.mxu0 %v321_v1  ;;  %289 = vmatpush3.msra.mxu1 %v125_v25 }
  0x16   :  { %270 = vmatpush3.msra.mxu0 %v24_v11  ;;  %290 = vmatprep.subr.mxu1 %v321_v1 }
  0x17   :  { %271 = vmatprep.subr.mxu0 %v321_v1  ;;  %291 = vmatpush3.msra.mxu1 %v124_v26 }
  0x18   :  { %272 = vmatpush3.msra.mxu0 %v23_v12 }
  0x19   :  { %274 = vmatmul.mubr.msk.f32.vlgmr.msra.gmra.mxu0 %vm39_vm1, %v22_v13 }
  0xd9   :  { %v109_v28 = vpop.f32.mrf.mxu0 }
  0xda   :  { %v110_v29 = vadd.f32 %v109_v28, %v38_v27 }
  0xdb   :  { %v275_v30 = vpop.f32.mrf.mxu0 }
  0xdc   :  { %v113_v31 = vmax.f32 %v110_v29, 0.0 }
  0xde   :  { %118 = vrot.lane.b32.xlu0 %v113_v31, %s323_s3 }
 0x150   :  { %v119_v32 = vpop.permute.xlu0 %118 }
 0x151   :  { %122 = vst.msk [vmem:[#allocation2] sm:$0xff] %vm121_vm3, %v119_v32 }
 0x158   :  { %v123_v33 = vld [vmem:[#allocation2] sm:$0xff] }
 0x159   :  { %293 = vmatmul.mubr.msk.f32.vlgmr.msra.gmra.mxu1 %vm136_vm4, %v123_v33 }
 0x219   :  { %v206_v36 = vpop.f32.mrf.mxu1 }
 0x21a   :  { %v207_v37 = vadd.f32 %v206_v36, %v135_v35 }
 0x21b   :  { %v294_v38 = vpop.f32.mrf.mxu1 }
 0x21c   :  { %210 = vst [vmem:[#allocation3] sm:$0xff] %v207_v37 }
 0x21d   :  { %310 = shalt.err (!%p307_p4)
}
 0x21e   :  { %220 = dma.vmem_to_hbm [thread:$0]  %s218_s11, 128, %s454_s5, [#allocation4]  }
 0x21f   :  { %319 = dma.done.wait [#allocation4], 128  }
 0x220   :  { %320 = vsyncadd [#allocation4], 4294967168 }
 0x221   :  { %224 = vsyncpa [#allocation4], 1 }

</bundles_post_ra>
